<compile_context>
chip_gen: v6e
topology: v6e:2x2x1
jax: 0.10.0
libtpu: 0.0.40
codegen_flags: <defaults>
</compile_context>

<pallas_src>
import functools

import jax
import jax.numpy as jnp
from jax.experimental import pallas as pl
from jax.experimental.pallas import tpu as pltpu

HIDDEN = 50          # hidden_size in the PyTorch module
N_REPEAT_L2 = 10     # linear2 is applied 10 times with shared weights
C_PAD = 128          # lane-dense padded class axis (real classes in lanes [0,C))
NEG_BIG = -1e30      # pad-lane bias: never wins the max, exp underflows to 0


def _model2_kernel(x_ref,
                   w1_ref, b1_ref,
                   w2_ref, b2_ref,
                   w3_ref, b3_ref,
                   out_ref):
    tb = x_ref.shape[0]

    # Hoist all parameter loads and bias broadcasts (b2 is reused 10x; JAX
    # does not CSE broadcast_in_dim, so hoisting avoids 10 per-iter broadcasts).
    x = x_ref[...]                                        # (tb, D)    bf16
    w1 = w1_ref[...]                                      # (D, 50)    bf16
    w2 = w2_ref[...]                                      # (50, 50)   bf16
    w3 = w3_ref[...]                                      # (50, 128)  bf16 (zero pad cols)
    b1 = jnp.broadcast_to(b1_ref[...], (tb, HIDDEN))      # f32
    b2 = jnp.broadcast_to(b2_ref[...], (tb, HIDDEN))      # f32
    b3 = jnp.broadcast_to(b3_ref[...], (tb, C_PAD))       # f32, pad lanes = -1e30

    # bf16 MXU matmuls with f32 accumulation; elementwise math stays f32.
    h = jnp.maximum(
        jnp.dot(x, w1, preferred_element_type=jnp.float32) + b1, 0.0)

    # Shared linear2 + ReLU applied 10 times (inherently serial chain).
    for _ in range(N_REPEAT_L2):
        h = jnp.maximum(
            jnp.dot(h.astype(jnp.bfloat16), w2,
                    preferred_element_type=jnp.float32) + b2, 0.0)

    # Lane-dense 128-wide logits: pad lanes = 0 (zero weight cols) + (-1e30).
    logits = jnp.dot(h.astype(jnp.bfloat16), w3,
                     preferred_element_type=jnp.float32) + b3

    # log_softmax over the class axis; pad lanes contribute exactly 0 to the
    # exp-sum and never win the max, so the 10 real lanes are correct.
    m = jnp.max(logits, axis=-1, keepdims=True)
    shifted = logits - m
    lse = jnp.log(jnp.sum(jnp.exp(shifted), axis=-1, keepdims=True))
    out_ref[...] = shifted - lse        # unmasked full-vreg (128-lane) store


def _round_up(v, m):
    return ((v + m - 1) // m) * m


@functools.partial(jax.jit, static_argnames=("num_classes", "tile_b"))
def model2_forward(x, params, num_classes, tile_b=2048):
    """x: (B, input_size) float32 -> (B, num_classes) float32 log-probs."""
    w1, b1, w2, b2, w3, b3 = params
    B, D = x.shape
    H = HIDDEN
    C = num_classes

    # bf16 MXU inputs; f32 accumulation happens inside the kernel.
    xb = x.astype(jnp.bfloat16)
    w1b = w1.astype(jnp.bfloat16)
    w2b = w2.astype(jnp.bfloat16)
    # Pad the class axis to 128 lanes: zero weight columns, -1e30 bias lanes.
    w3b = jnp.pad(w3, ((0, 0), (0, C_PAD - C))).astype(jnp.bfloat16)
    b3p = jnp.pad(b3.astype(jnp.float32), ((0, 0), (0, C_PAD - C)),
                  constant_values=NEG_BIG)
    b1f = b1.astype(jnp.float32)
    b2f = b2.astype(jnp.float32)

    # Batch tiling:
    #  * tiny B: one padded tile (rounded up to a multiple of 8 sublanes)
    #  * otherwise at least 2 grid steps so both v7x TensorCores get work,
    #    capped at tile_b (2048 bf16 rows keeps double-buffered x + f32 out +
    #    resident weights ~10 MiB, under the v5e/v6e/v7x default scoped VMEM).
    if B <= 16:
        tb = _round_up(B, 8)
    else:
        tb = min(tile_b, _round_up(pl.cdiv(B, 2), 8))
    n_tiles = pl.cdiv(B, tb)
    pB = n_tiles * tb
    if pB != B:
        xb = jnp.pad(xb, ((0, pB - B), (0, 0)))

    const2d = lambda i: (0, 0)
    in_specs = [
        pl.BlockSpec((tb, D), lambda i: (i, 0)),     # x: streamed per tile
        pl.BlockSpec((D, H), const2d),               # w1 (resident across grid)
        pl.BlockSpec((1, H), const2d),               # b1
        pl.BlockSpec((H, H), const2d),               # w2
        pl.BlockSpec((1, H), const2d),               # b2
        pl.BlockSpec((H, C_PAD), const2d),           # w3 (lane-padded)
        pl.BlockSpec((1, C_PAD), const2d),           # b3 (lane-padded)
    ]
    out_specs = pl.BlockSpec((tb, C_PAD), lambda i: (i, 0))

    flops = 2 * pB * (D * H + N_REPEAT_L2 * H * H + H * C_PAD)
    bytes_accessed = (2 * pB * D                      # bf16 x
                      + 4 * pB * C_PAD                # f32 padded output
                      + 2 * (D * H + H * H + H * C_PAD)
                      + 4 * (2 * H + C_PAD))
    cost = pl.CostEstimate(flops=flops,
                           transcendentals=pB * (C_PAD + 1),
                           bytes_accessed=bytes_accessed)

    out = pl.pallas_call(
        _model2_kernel,
        out_shape=jax.ShapeDtypeStruct((pB, C_PAD), jnp.float32),
        grid=(n_tiles,),
        in_specs=in_specs,
        out_specs=out_specs,
        compiler_params=pltpu.CompilerParams(
            dimension_semantics=("parallel",)),
        cost_estimate=cost,
    )(xb, w1b, b1f, w2b, b2f, w3b, b3p)

    return out[:B, :C]


def init_params(key, input_size, num_classes):
    """Deterministic nn.Linear-style init (uniform +/- 1/sqrt(fan_in))."""
    dims = [
        (input_size, HIDDEN),     # linear1
        (HIDDEN, HIDDEN),         # linear2 (shared, applied 10x)
        (HIDDEN, num_classes),    # linear3
    ]
    params = []
    keys = jax.random.split(key, 2 * len(dims))
    for i, (fan_in, fan_out) in enumerate(dims):
        bound = 1.0 / (fan_in ** 0.5)
        w = jax.random.uniform(keys[2 * i], (fan_in, fan_out),
                               minval=-bound, maxval=bound, dtype=jnp.float32)
        b = jax.random.uniform(keys[2 * i + 1], (1, fan_out),
                               minval=-bound, maxval=bound, dtype=jnp.float32)
        params += [w, b]
    return tuple(params)


def reference_forward_f32(x, params):
    """Pure-JAX f32 reference replicating the PyTorch forward exactly."""
    w1, b1, w2, b2, w3, b3 = params
    h = jnp.maximum(x @ w1 + b1, 0.0)
    for _ in range(N_REPEAT_L2):
        h = jnp.maximum(h @ w2 + b2, 0.0)
    logits = h @ w3 + b3
    return jax.nn.log_softmax(logits, axis=-1)


def reference_forward_bf16(x, params):
    """Pure-JAX reference matching the kernel's bf16-input / f32-accum math."""
    w1, b1, w2, b2, w3, b3 = params
    h = jnp.maximum(
        jnp.dot(x.astype(jnp.bfloat16), w1.astype(jnp.bfloat16),
                preferred_element_type=jnp.float32) + b1, 0.0)
    for _ in range(N_REPEAT_L2):
        h = jnp.maximum(
            jnp.dot(h.astype(jnp.bfloat16), w2.astype(jnp.bfloat16),
                    preferred_element_type=jnp.float32) + b2, 0.0)
    logits = jnp.dot(h.astype(jnp.bfloat16), w3.astype(jnp.bfloat16),
                     preferred_element_type=jnp.float32) + b3
    return jax.nn.log_softmax(logits, axis=-1)


if __name__ == "__main__":
    input_size = 784          # 28*28 flattened image, as the FC model implies
    num_classes = 10
    batch = 8

    key = jax.random.PRNGKey(0)
    k_x, k_p = jax.random.split(key)
    x = jax.random.normal(k_x, (batch, input_size), dtype=jnp.float32)
    params = init_params(k_p, input_size, num_classes)

    out = model2_forward(x, params, num_classes)
    out = jax.block_until_ready(out)
    assert out.shape == (batch, num_classes)

    # Tight check against a bf16-matched reference (same math as the kernel).
    ref_bf16 = reference_forward_bf16(x, params)
    assert jnp.allclose(out, ref_bf16, atol=2e-3, rtol=2e-3)

    # Looser check against the f32 PyTorch-semantics reference.
    ref_f32 = reference_forward_f32(x, params)
    assert jnp.allclose(out, ref_f32, atol=5e-2, rtol=5e-2)

    print("KERNEL_OK")
</pallas_src>

<mosaic_0001>
module attributes {stable_mosaic.version = 11 : i64} {
  func.func @_model2_kernel(%arg0: i32, %arg1: memref<8x784xbf16, #tpu.memory_space<vmem>>, %arg2: memref<784x50xbf16, #tpu.memory_space<vmem>>, %arg3: memref<1x50xf32, #tpu.memory_space<vmem>>, %arg4: memref<50x50xbf16, #tpu.memory_space<vmem>>, %arg5: memref<1x50xf32, #tpu.memory_space<vmem>>, %arg6: memref<50x128xbf16, #tpu.memory_space<vmem>>, %arg7: memref<1x128xf32, #tpu.memory_space<vmem>>, %arg8: memref<8x128xf32, #tpu.memory_space<vmem>>) attributes {dimension_semantics = [#tpu.dimension_semantics<parallel>], iteration_bounds = array<i64: 1>, scalar_prefetch = 0 : i64, scratch_operands = 0 : i64, tpu.core_type = #tpu.core_type<tc>, window_params = [{transform_indices = @transform_0, window_bounds = array<i64: 8, 784>}, {pipeline_mode = #tpu.pipeline_mode<synchronous>, transform_indices = @transform_1, window_bounds = array<i64: 784, 50>}, {pipeline_mode = #tpu.pipeline_mode<synchronous>, transform_indices = @transform_2, window_bounds = array<i64: 1, 50>}, {pipeline_mode = #tpu.pipeline_mode<synchronous>, transform_indices = @transform_3, window_bounds = array<i64: 50, 50>}, {pipeline_mode = #tpu.pipeline_mode<synchronous>, transform_indices = @transform_4, window_bounds = array<i64: 1, 50>}, {pipeline_mode = #tpu.pipeline_mode<synchronous>, transform_indices = @transform_5, window_bounds = array<i64: 50, 128>}, {pipeline_mode = #tpu.pipeline_mode<synchronous>, transform_indices = @transform_6, window_bounds = array<i64: 1, 128>}, {transform_indices = @transform_7, window_bounds = array<i64: 8, 128>}]} {
    %c0 = arith.constant 0 : index
    %c0_0 = arith.constant 0 : index
    %0 = vector.load %arg1[%c0, %c0_0] : memref<8x784xbf16, #tpu.memory_space<vmem>>, vector<8x784xbf16>
    %c0_1 = arith.constant 0 : index
    %c0_2 = arith.constant 0 : index
    %1 = vector.load %arg2[%c0_1, %c0_2] : memref<784x50xbf16, #tpu.memory_space<vmem>>, vector<784x50xbf16>
    %c0_3 = arith.constant 0 : index
    %c0_4 = arith.constant 0 : index
    %2 = vector.load %arg4[%c0_3, %c0_4] : memref<50x50xbf16, #tpu.memory_space<vmem>>, vector<50x50xbf16>
    %c0_5 = arith.constant 0 : index
    %c0_6 = arith.constant 0 : index
    %3 = vector.load %arg6[%c0_5, %c0_6] : memref<50x128xbf16, #tpu.memory_space<vmem>>, vector<50x128xbf16>
    %c0_7 = arith.constant 0 : index
    %c0_8 = arith.constant 0 : index
    %4 = vector.load %arg3[%c0_7, %c0_8] : memref<1x50xf32, #tpu.memory_space<vmem>>, vector<1x50xf32>
    %5 = vector.shape_cast %4 : vector<1x50xf32> to vector<1x50xf32>
    %6 = vector.broadcast %5 : vector<1x50xf32> to vector<8x50xf32>
    %c0_9 = arith.constant 0 : index
    %c0_10 = arith.constant 0 : index
    %7 = vector.load %arg5[%c0_9, %c0_10] : memref<1x50xf32, #tpu.memory_space<vmem>>, vector<1x50xf32>
    %8 = vector.shape_cast %7 : vector<1x50xf32> to vector<1x50xf32>
    %9 = vector.broadcast %8 : vector<1x50xf32> to vector<8x50xf32>
    %c0_11 = arith.constant 0 : index
    %c0_12 = arith.constant 0 : index
    %10 = vector.load %arg7[%c0_11, %c0_12] : memref<1x128xf32, #tpu.memory_space<vmem>>, vector<1x128xf32>
    %11 = vector.shape_cast %10 : vector<1x128xf32> to vector<1x128xf32>
    %12 = vector.broadcast %11 : vector<1x128xf32> to vector<8x128xf32>
    %cst = arith.constant dense<0.000000e+00> : vector<8x50xf32>
    %13 = tpu.matmul %0, %1, %cst {dimension_numbers = #tpu.dot_dimension_numbers<[1], [0], [0], [1], [0, 0, 1, 1], [], []>} : vector<8x784xbf16>, vector<784x50xbf16>, vector<8x50xf32> -> vector<8x50xf32>
    %14 = arith.addf %13, %6 : vector<8x50xf32>
    %cst_13 = arith.constant 0.000000e+00 : f32
    %15 = vector.broadcast %cst_13 : f32 to vector<8x50xf32>
    %16 = arith.maximumf %14, %15 : vector<8x50xf32>
    %17 = arith.truncf %16 : vector<8x50xf32> to vector<8x50xbf16>
    %cst_14 = arith.constant dense<0.000000e+00> : vector<8x50xf32>
    %18 = tpu.matmul %17, %2, %cst_14 {dimension_numbers = #tpu.dot_dimension_numbers<[1], [0], [0], [1], [0, 0, 1, 1], [], []>} : vector<8x50xbf16>, vector<50x50xbf16>, vector<8x50xf32> -> vector<8x50xf32>
    %19 = arith.addf %18, %9 : vector<8x50xf32>
    %cst_15 = arith.constant 0.000000e+00 : f32
    %20 = vector.broadcast %cst_15 : f32 to vector<8x50xf32>
    %21 = arith.maximumf %19, %20 : vector<8x50xf32>
    %22 = arith.truncf %21 : vector<8x50xf32> to vector<8x50xbf16>
    %cst_16 = arith.constant dense<0.000000e+00> : vector<8x50xf32>
    %23 = tpu.matmul %22, %2, %cst_16 {dimension_numbers = #tpu.dot_dimension_numbers<[1], [0], [0], [1], [0, 0, 1, 1], [], []>} : vector<8x50xbf16>, vector<50x50xbf16>, vector<8x50xf32> -> vector<8x50xf32>
    %24 = arith.addf %23, %9 : vector<8x50xf32>
    %cst_17 = arith.constant 0.000000e+00 : f32
    %25 = vector.broadcast %cst_17 : f32 to vector<8x50xf32>
    %26 = arith.maximumf %24, %25 : vector<8x50xf32>
    %27 = arith.truncf %26 : vector<8x50xf32> to vector<8x50xbf16>
    %cst_18 = arith.constant dense<0.000000e+00> : vector<8x50xf32>
    %28 = tpu.matmul %27, %2, %cst_18 {dimension_numbers = #tpu.dot_dimension_numbers<[1], [0], [0], [1], [0, 0, 1, 1], [], []>} : vector<8x50xbf16>, vector<50x50xbf16>, vector<8x50xf32> -> vector<8x50xf32>
    %29 = arith.addf %28, %9 : vector<8x50xf32>
    %cst_19 = arith.constant 0.000000e+00 : f32
    %30 = vector.broadcast %cst_19 : f32 to vector<8x50xf32>
    %31 = arith.maximumf %29, %30 : vector<8x50xf32>
    %32 = arith.truncf %31 : vector<8x50xf32> to vector<8x50xbf16>
    %cst_20 = arith.constant dense<0.000000e+00> : vector<8x50xf32>
    %33 = tpu.matmul %32, %2, %cst_20 {dimension_numbers = #tpu.dot_dimension_numbers<[1], [0], [0], [1], [0, 0, 1, 1], [], []>} : vector<8x50xbf16>, vector<50x50xbf16>, vector<8x50xf32> -> vector<8x50xf32>
    %34 = arith.addf %33, %9 : vector<8x50xf32>
    %cst_21 = arith.constant 0.000000e+00 : f32
    %35 = vector.broadcast %cst_21 : f32 to vector<8x50xf32>
    %36 = arith.maximumf %34, %35 : vector<8x50xf32>
    %37 = arith.truncf %36 : vector<8x50xf32> to vector<8x50xbf16>
    %cst_22 = arith.constant dense<0.000000e+00> : vector<8x50xf32>
    %38 = tpu.matmul %37, %2, %cst_22 {dimension_numbers = #tpu.dot_dimension_numbers<[1], [0], [0], [1], [0, 0, 1, 1], [], []>} : vector<8x50xbf16>, vector<50x50xbf16>, vector<8x50xf32> -> vector<8x50xf32>
    %39 = arith.addf %38, %9 : vector<8x50xf32>
    %cst_23 = arith.constant 0.000000e+00 : f32
    %40 = vector.broadcast %cst_23 : f32 to vector<8x50xf32>
    %41 = arith.maximumf %39, %40 : vector<8x50xf32>
    %42 = arith.truncf %41 : vector<8x50xf32> to vector<8x50xbf16>
    %cst_24 = arith.constant dense<0.000000e+00> : vector<8x50xf32>
    %43 = tpu.matmul %42, %2, %cst_24 {dimension_numbers = #tpu.dot_dimension_numbers<[1], [0], [0], [1], [0, 0, 1, 1], [], []>} : vector<8x50xbf16>, vector<50x50xbf16>, vector<8x50xf32> -> vector<8x50xf32>
    %44 = arith.addf %43, %9 : vector<8x50xf32>
    %cst_25 = arith.constant 0.000000e+00 : f32
    %45 = vector.broadcast %cst_25 : f32 to vector<8x50xf32>
    %46 = arith.maximumf %44, %45 : vector<8x50xf32>
    %47 = arith.truncf %46 : vector<8x50xf32> to vector<8x50xbf16>
    %cst_26 = arith.constant dense<0.000000e+00> : vector<8x50xf32>
    %48 = tpu.matmul %47, %2, %cst_26 {dimension_numbers = #tpu.dot_dimension_numbers<[1], [0], [0], [1], [0, 0, 1, 1], [], []>} : vector<8x50xbf16>, vector<50x50xbf16>, vector<8x50xf32> -> vector<8x50xf32>
    %49 = arith.addf %48, %9 : vector<8x50xf32>
    %cst_27 = arith.constant 0.000000e+00 : f32
    %50 = vector.broadcast %cst_27 : f32 to vector<8x50xf32>
    %51 = arith.maximumf %49, %50 : vector<8x50xf32>
    %52 = arith.truncf %51 : vector<8x50xf32> to vector<8x50xbf16>
    %cst_28 = arith.constant dense<0.000000e+00> : vector<8x50xf32>
    %53 = tpu.matmul %52, %2, %cst_28 {dimension_numbers = #tpu.dot_dimension_numbers<[1], [0], [0], [1], [0, 0, 1, 1], [], []>} : vector<8x50xbf16>, vector<50x50xbf16>, vector<8x50xf32> -> vector<8x50xf32>
    %54 = arith.addf %53, %9 : vector<8x50xf32>
    %cst_29 = arith.constant 0.000000e+00 : f32
    %55 = vector.broadcast %cst_29 : f32 to vector<8x50xf32>
    %56 = arith.maximumf %54, %55 : vector<8x50xf32>
    %57 = arith.truncf %56 : vector<8x50xf32> to vector<8x50xbf16>
    %cst_30 = arith.constant dense<0.000000e+00> : vector<8x50xf32>
    %58 = tpu.matmul %57, %2, %cst_30 {dimension_numbers = #tpu.dot_dimension_numbers<[1], [0], [0], [1], [0, 0, 1, 1], [], []>} : vector<8x50xbf16>, vector<50x50xbf16>, vector<8x50xf32> -> vector<8x50xf32>
    %59 = arith.addf %58, %9 : vector<8x50xf32>
    %cst_31 = arith.constant 0.000000e+00 : f32
    %60 = vector.broadcast %cst_31 : f32 to vector<8x50xf32>
    %61 = arith.maximumf %59, %60 : vector<8x50xf32>
    %62 = arith.truncf %61 : vector<8x50xf32> to vector<8x50xbf16>
    %cst_32 = arith.constant dense<0.000000e+00> : vector<8x50xf32>
    %63 = tpu.matmul %62, %2, %cst_32 {dimension_numbers = #tpu.dot_dimension_numbers<[1], [0], [0], [1], [0, 0, 1, 1], [], []>} : vector<8x50xbf16>, vector<50x50xbf16>, vector<8x50xf32> -> vector<8x50xf32>
    %64 = arith.addf %63, %9 : vector<8x50xf32>
    %cst_33 = arith.constant 0.000000e+00 : f32
    %65 = vector.broadcast %cst_33 : f32 to vector<8x50xf32>
    %66 = arith.maximumf %64, %65 : vector<8x50xf32>
    %67 = arith.truncf %66 : vector<8x50xf32> to vector<8x50xbf16>
    %cst_34 = arith.constant dense<0.000000e+00> : vector<8x128xf32>
    %68 = tpu.matmul %67, %3, %cst_34 {dimension_numbers = #tpu.dot_dimension_numbers<[1], [0], [0], [1], [0, 0, 1, 1], [], []>} : vector<8x50xbf16>, vector<50x128xbf16>, vector<8x128xf32> -> vector<8x128xf32>
    %69 = arith.addf %68, %12 : vector<8x128xf32>
    %cst_35 = arith.constant dense<0xFF800000> : vector<8xf32>
    %70 = vector.multi_reduction <maximumf>, %69, %cst_35 [1] : vector<8x128xf32> to vector<8xf32>
    %71 = vector.shape_cast %70 : vector<8xf32> to vector<8x1xf32>
    %72 = vector.broadcast %71 : vector<8x1xf32> to vector<8x128xf32>
    %73 = arith.subf %69, %72 : vector<8x128xf32>
    %74 = math.exp %73 : vector<8x128xf32>
    %cst_36 = arith.constant dense<0.000000e+00> : vector<8xf32>
    %75 = vector.multi_reduction <add>, %74, %cst_36 [1] : vector<8x128xf32> to vector<8xf32>
    %76 = vector.shape_cast %75 : vector<8xf32> to vector<8x1xf32>
    %77 = math.log %76 : vector<8x1xf32>
    %78 = vector.broadcast %77 : vector<8x1xf32> to vector<8x128xf32>
    %79 = arith.subf %73, %78 : vector<8x128xf32>
    %c0_37 = arith.constant 0 : index
    %c0_38 = arith.constant 0 : index
    %80 = vector.load %arg8[%c0_37, %c0_38] : memref<8x128xf32, #tpu.memory_space<vmem>>, vector<8x128xf32>
    tpu.vector_store %arg8[%c0_37, %c0_38], %79 {strides = array<i32>} : memref<8x128xf32, #tpu.memory_space<vmem>>, vector<8x128xf32>,
    return
  }
  func.func @transform_0(%arg0: i32) -> (i32, i32) {
    %c0_i32 = arith.constant 0 : i32
    %c0_i32_0 = arith.constant 0 : i32
    return %arg0, %c0_i32 : i32, i32
  }
  func.func @transform_1(%arg0: i32) -> (i32, i32) {
    %c0_i32 = arith.constant 0 : i32
    %c0_i32_0 = arith.constant 0 : i32
    %c0_i32_1 = arith.constant 0 : i32
    return %c0_i32, %c0_i32_0 : i32, i32
  }
  func.func @transform_2(%arg0: i32) -> (i32, i32) {
    %c0_i32 = arith.constant 0 : i32
    %c0_i32_0 = arith.constant 0 : i32
    %c0_i32_1 = arith.constant 0 : i32
    return %c0_i32, %c0_i32_0 : i32, i32
  }
  func.func @transform_3(%arg0: i32) -> (i32, i32) {
    %c0_i32 = arith.constant 0 : i32
    %c0_i32_0 = arith.constant 0 : i32
    %c0_i32_1 = arith.constant 0 : i32
    return %c0_i32, %c0_i32_0 : i32, i32
  }
  func.func @transform_4(%arg0: i32) -> (i32, i32) {
    %c0_i32 = arith.constant 0 : i32
    %c0_i32_0 = arith.constant 0 : i32
    %c0_i32_1 = arith.constant 0 : i32
    return %c0_i32, %c0_i32_0 : i32, i32
  }
  func.func @transform_5(%arg0: i32) -> (i32, i32) {
    %c0_i32 = arith.constant 0 : i32
    %c0_i32_0 = arith.constant 0 : i32
    %c0_i32_1 = arith.constant 0 : i32
    return %c0_i32, %c0_i32_0 : i32, i32
  }
  func.func @transform_6(%arg0: i32) -> (i32, i32) {
    %c0_i32 = arith.constant 0 : i32
    %c0_i32_0 = arith.constant 0 : i32
    %c0_i32_1 = arith.constant 0 : i32
    return %c0_i32, %c0_i32_0 : i32, i32
  }
  func.func @transform_7(%arg0: i32) -> (i32, i32) {
    %c0_i32 = arith.constant 0 : i32
    %c0_i32_0 = arith.constant 0 : i32
    return %arg0, %c0_i32 : i32, i32
  }
}

</mosaic_0001>

<bundles_post_ra>
// kernel: model2_forward.1
= control target key start
LH: loop header
LB: loop body
LE: loop exit
PB: predicated region body
PF: predicated region fallthrough
CT: control target
= control target key end

     0   :  { %v1650_v43 = vmov 0.0   ;;  %vm1651_vm0 = vmmov 0   ;;  %vm483_vm1 = vcmask 130048   ;;  %s2030_s0 = inlined_call_operand.vmem [shape: bf16[8,784], index: 0, kind: input, shape index: {}]   ;;  %s2031_s1 = inlined_call_operand.vmem [shape: bf16[784,50], index: 1, kind: input, shape index: {}]   ;;  %s2032_s2 = inlined_call_operand.vmem [shape: f32[1,50], index: 2, kind: input, shape index: {}]   ;;  %s2033_s3 = inlined_call_operand.vmem [shape: bf16[50,50], index: 3, kind: input, shape index: {}]   ;;  %s2034_s4 = inlined_call_operand.vmem [shape: f32[1,50], index: 4, kind: input, shape index: {}]   ;;  %s2035_s5 = inlined_call_operand.vmem [shape: bf16[50,128], index: 5, kind: input, shape index: {}]   ;;  %s2036_s6 = inlined_call_operand.vmem [shape: f32[1,128], index: 6, kind: input, shape index: {}]   ;;  %s2037_s7 = inlined_call_operand.hbm [shape: f32[8,128], index: 7, kind: output, shape index: {}]  }
   0x1   :  { %v1560_v0 = vld [vmem:[%s2031_s1 + $0x78] sm:$0xff]   ;;  %v1564_v4 = vld [vmem:[%s2031_s1 + $0x70] sm:$0xff]   ;;  %v1568_v8 = vld [vmem:[%s2031_s1 + $0x68] sm:$0xff]  }
   0x2   :  { %v1561_v1 = vld [vmem:[%s2031_s1 + $0x38] sm:$0xff]   ;;  %1296 = vmatprep.subr.bf16.mxu0 %v1560_v0  ;;  %v1565_v5 = vld [vmem:[%s2031_s1 + $0x30] sm:$0xff]   ;;  %v1569_v9 = vld [vmem:[%s2031_s1 + $0x28] sm:$0xff]  }
   0x3   :  { %v1562_v2 = vld [vmem:[%s2031_s1 + $0xf8] sm:$0xff]   ;;  %1297 = vmatpush3.bf16.msra.mxu0 %v1561_v1  ;;  %v1566_v6 = vld [vmem:[%s2031_s1 + $0xf0] sm:$0xff]   ;;  %v1570_v10 = vld [vmem:[%s2031_s1 + $0xe8] sm:$0xff]  }
   0x4   :  { %v1563_v3 = vld [vmem:[%s2031_s1 + $0xb8] sm:$0xff]   ;;  %1318 = vmatprep.subr.bf16.mxu1 %v1562_v2  ;;  %1298 = vmatprep.subr.bf16.mxu0 %v1564_v4  ;;  %v1567_v7 = vld [vmem:[%s2031_s1 + $0xb0] sm:$0xff]   ;;  %v1571_v11 = vld [vmem:[%s2031_s1 + $0xa8] sm:$0xff]  }
   0x5   :  { %1319 = vmatpush3.bf16.msra.mxu1 %v1563_v3  ;;  %v1572_v12 = vld [vmem:[%s2031_s1 + $0x60] sm:$0xff]   ;;  %v1576_v16 = vld [vmem:[%s2031_s1 + $0x58] sm:$0xff]   ;;  %v1580_v20 = vld [vmem:[%s2031_s1 + $0x50] sm:$0xff]  }
   0x6   :  { %1320 = vmatprep.subr.bf16.mxu1 %v1566_v6  ;;  %v1573_v13 = vld [vmem:[%s2031_s1 + $0x20] sm:$0xff]   ;;  %v1577_v17 = vld [vmem:[%s2031_s1 + $0x18] sm:$0xff]   ;;  %v1581_v21 = vld [vmem:[%s2031_s1 + $0x10] sm:$0xff]  }
   0x7   :  { %1299 = vmatpush3.bf16.msra.mxu0 %v1565_v5  ;;  %v1574_v14 = vld [vmem:[%s2031_s1 + $0xe0] sm:$0xff]   ;;  %v1578_v18 = vld [vmem:[%s2031_s1 + $0xd8] sm:$0xff]   ;;  %v1582_v22 = vld [vmem:[%s2031_s1 + $0xd0] sm:$0xff]  }
   0x8   :  { %1300 = vmatprep.subr.bf16.mxu0 %v1568_v8  ;;  %v1575_v15 = vld [vmem:[%s2031_s1 + $0xa0] sm:$0xff]   ;;  %v1579_v19 = vld [vmem:[%s2031_s1 + $0x98] sm:$0xff]   ;;  %v1583_v23 = vld [vmem:[%s2031_s1 + $0x90] sm:$0xff]  }
   0x9   :  { %1321 = vmatpush3.bf16.msra.mxu1 %v1567_v7  ;;  %v1584_v24 = vld [vmem:[%s2031_s1 + $0x48] sm:$0xff]   ;;  %v1588_v28 = vld [vmem:[%s2031_s1 + $0x40] sm:$0xff]   ;;  %v1594_v35 = vld [vmem:[%s2031_s1 + $0x178] sm:$0xff]  }
   0xa   :  { %1322 = vmatprep.subr.bf16.mxu1 %v1570_v10  ;;  %v1585_v25 = vld [vmem:[%s2031_s1 + $0x8] sm:$0xff]   ;;  %v1589_v29 = vld [vmem:[%s2031_s1] sm:$0xff]   ;;  %v1597_v39 = vld [vmem:[%s2031_s1 + $0x138] sm:$0xff]  }
   0xb   :  { %1301 = vmatpush3.bf16.msra.mxu0 %v1569_v9  ;;  %v1586_v26 = vld [vmem:[%s2031_s1 + $0xc8] sm:$0xff]   ;;  %v1590_v30 = vld [vmem:[%s2031_s1 + $0xc0] sm:$0xff]   ;;  %v1598_v40 = vld [vmem:[%s2031_s1 + $0x170] sm:$0xff]  }
   0xc   :  { %1302 = vmatprep.subr.bf16.mxu0 %v1572_v12  ;;  %v1587_v27 = vld [vmem:[%s2031_s1 + $0x88] sm:$0xff]   ;;  %v28_v31 = vld [vmem:[%s2030_s0] sm:$0xff]  ;;  %v1599_v41 = vld [vmem:[%s2031_s1 + $0x130] sm:$0xff]  }
   0xd   :  { %1323 = vmatpush3.bf16.msra.mxu1 %v1571_v11  ;;  %v1220_v32 = vcombine.low %v28_v31, %v28_v31  ;;  %v1221_v33 = vcombine.high %v28_v31, %v28_v31  ;;  %v1593_v34 = vld [vmem:[%s2031_s1 + $0x80] sm:$0xff]   ;;  %v29_v36 = vld [vmem:[%s2030_s0 + $0x8] sm:$0xff]  ;;  %v1604_v47 = vld [vmem:[%s2031_s1 + $0x158] sm:$0xff]  }
   0xe   :  { %1324 = vmatprep.subr.bf16.mxu1 %v1574_v14  ;;  %v1222_v37 = vcombine.low %v29_v36, %v29_v36  ;;  %v1223_v38 = vcombine.high %v29_v36, %v29_v36  ;;  %v1600_v42 = vld [vmem:[%s2031_s1 + $0x168] sm:$0xff]   ;;  %v1602_v45 = vld [vmem:[%s2031_s1 + $0x160] sm:$0xff]   ;;  %v1605_v48 = vld [vmem:[%s2031_s1 + $0x118] sm:$0xff]  }
   0xf   :  { %1303 = vmatpush3.bf16.msra.mxu0 %v1573_v13  ;;  %519 = vmatprep.mubr.bf16.mxu0 %v1221_v33  ;;  %v1601_v44 = vld [vmem:[%s2031_s1 + $0x128] sm:$0xff]   ;;  %v1603_v46 = vld [vmem:[%s2031_s1 + $0x120] sm:$0xff]   ;;  %v1606_v49 = vld [vmem:[%s2031_s1 + $0x150] sm:$0xff]  }
  0x10   :  { %1304 = vmatprep.subr.bf16.mxu0 %v1576_v16  ;;  %559 = vmatprep.mubr.bf16.mxu1 %v1223_v38  ;;  %v1612_v50 = vld [vmem:[%s2031_s1 + $0x180] sm:$0xff]   ;;  %v30_v51 = vld [vmem:[%s2030_s0 + $0x10] sm:$0xff]  ;;  %v1615_v54 = vld [vmem:[%s2030_s0 + $0x18] ss:$0 sps:$4 sm:$0xff]  }
  0x11   :  { %1325 = vmatpush3.bf16.msra.mxu1 %v1575_v15  ;;  %v1607_v52 = vld [vmem:[%s2031_s1 + $0x110] sm:$0xff]   ;;  %v1225_v53 = vcombine.high %v30_v51, %v30_v51  ;;  %v1608_v55 = vld [vmem:[%s2031_s1 + $0x148] sm:$0xff]  }
  0x12   :  { %1326 = vmatprep.subr.bf16.mxu1 %v1578_v18 }
  0x13   :  { %1305 = vmatpush3.bf16.msra.mxu0 %v1577_v17 }
  0x14   :  { %1306 = vmatprep.subr.bf16.mxu0 %v1580_v20 }
  0x15   :  { %1327 = vmatpush3.bf16.msra.mxu1 %v1579_v19 }
  0x16   :  { %1328 = vmatprep.subr.bf16.mxu1 %v1582_v22 }
  0x17   :  { %1307 = vmatpush3.bf16.msra.mxu0 %v1581_v21 }
  0x18   :  { %1308 = vmatprep.subr.bf16.mxu0 %v1584_v24 }
  0x19   :  { %1329 = vmatpush3.bf16.msra.mxu1 %v1583_v23 }
  0x1a   :  { %1330 = vmatprep.subr.bf16.mxu1 %v1586_v26 }
  0x1b   :  { %1309 = vmatpush3.bf16.msra.mxu0 %v1585_v25 }
  0x1c   :  { %1310 = vmatprep.subr.bf16.mxu0 %v1588_v28 }
  0x1d   :  { %1331 = vmatpush3.bf16.msra.mxu1 %v1587_v27 }
  0x1e   :  { %1332 = vmatprep.subr.bf16.mxu1 %v1590_v30 }
  0x1f   :  { %1311 = vmatpush3.bf16.msra.mxu0 %v1589_v29 }
  0x20   :  { %1340 = vmatprep.subr.bf16.mxu0 %v1594_v35 }
  0x21   :  { %1333 = vmatpush3.bf16.msra.mxu1 %v1593_v34 }
  0x22   :  { %520 = vmatmul.mubr.bf16.vlgmr.msra.gmra.mxu0 %v1220_v32  ;;  %1419 = vmatprep.subr.bf16.mxu1 %v1650_v43 }
  0x23   :  { %1341 = vmatpush3.bf16.msra.mxu0 %v1597_v39  ;;  %599 = vmatprep.mubr.bf16.mxu0 %v1225_v53 }
  0x24   :  { %560 = vmatmul.mubr.bf16.vlgmr.msra.gmra.mxu1 %v1222_v37  ;;  %1342 = vmatprep.subr.bf16.mxu0 %v1598_v40 }
  0x25   :  { %1421 = vmatprep.mubr.msk.bf16.mxu1 %vm1651_vm0, %v1650_v43  ;;  %1420 = vmatpush3.bf16.msra.mxu1 %v1612_v50 }
  0x26   :  { %1425 = vmatprep.subr.bf16.mxu1 %v1650_v43 }
  0x27   :  { %1343 = vmatpush3.bf16.msra.mxu0 %v1599_v41 }
  0x28   :  { %1344 = vmatprep.subr.bf16.mxu0 %v1600_v42 }
  0x2b   :  { %1345 = vmatpush3.bf16.msra.mxu0 %v1601_v44 }
  0x2c   :  { %1346 = vmatprep.subr.bf16.mxu0 %v1602_v45  ;;  %1422 = vmatmul.mubr.msk.bf16.vlgmr.msra.gmra.mxu1 %vm483_vm1, %v1615_v54 }
  0x2d   :  { %1433 = vmatprep.mubr.msk.bf16.mxu1 %vm1651_vm0, %v1650_v43 }
  0x2f   :  { %1347 = vmatpush3.bf16.msra.mxu0 %v1603_v46 }
  0x30   :  { %1348 = vmatprep.subr.bf16.mxu0 %v1604_v47 }
  0x33   :  { %1349 = vmatpush3.bf16.msra.mxu0 %v1605_v48 }
  0x34   :  { %1350 = vmatprep.subr.bf16.mxu0 %v1606_v49 }
  0x35   :  { %12 = vsyncpa [#allocation3], 0  ;;  %v1609_v56 = vld [vmem:[%s2031_s1 + $0x108] sm:$0xff]   ;;  %v1610_v57 = vld [vmem:[%s2031_s1 + $0x140] sm:$0xff]   ;;  %v1224_v59 = vcombine.low %v30_v51, %v30_v51  ;;  %vm674_vm2 = vcmask 1040384   ;;  %vm670_vm3 = vcmask 408576  }
  0x36   :  { %v1611_v58 = vld [vmem:[%s2031_s1 + $0x100] sm:$0xff]   ;;  %v1616_v60 = vld [vmem:[%s2033_s3 + $0x18] ss:$0 sps:$4 sm:$0x11]   ;;  %v1874_v62 = vld [vmem:[%s2033_s3 + $0x10] sm:$0xff]  }
  0x37   :  { %1351 = vmatpush3.bf16.msra.mxu0 %v1607_v52  ;;  %v1865_v61 = vsel %vm674_vm2, %v1616_v60, 0  ;;  %v1883_v63 = vld [vmem:[%s2033_s3 + $0x8] sm:$0xff]   ;;  %v1892_v0 = vld [vmem:[%s2033_s3] sm:$0xff]  }
  0x38   :  { %1352 = vmatprep.subr.bf16.mxu0 %v1608_v55  ;;  %1426 = vmatpush3.bf16.msra.mxu1 %v1865_v61  ;;  %v1217_v14 = vld [vmem:[%s2032_s2] ss:$0 sm:$0xff] }
  0x39   :  { %1427 = vmatprep.subr.bf16.mxu1 %v1650_v43  ;;  %v1915_v27 = vld [vmem:[%s2034_s4] ss:$0 sm:$0xff] }
  0x3b   :  { %1353 = vmatpush3.bf16.msra.mxu0 %v1609_v56 }
  0x3c   :  { %1354 = vmatprep.subr.bf16.mxu0 %v1610_v57  ;;  %1428 = vmatpush3.bf16.msra.mxu1 %v1874_v62 }
  0x3d   :  { %1429 = vmatprep.subr.bf16.mxu1 %v1650_v43 }
  0x3f   :  { %1355 = vmatpush3.bf16.msra.mxu0 %v1611_v58 }
  0x40   :  { %1449 = vmatprep.subr.bf16.mxu0 %v1650_v43  ;;  %1430 = vmatpush3.bf16.msra.mxu1 %v1883_v63 }
  0x41   :  { %1431 = vmatprep.subr.bf16.mxu1 %v1650_v43 }
  0x42   :  { %600 = vmatmul.mubr.bf16.vlgmr.msra.gmra.mxu0 %v1224_v59 }
  0x43   :  { %1457 = vmatprep.mubr.msk.bf16.mxu0 %vm1651_vm0, %v1650_v43  ;;  %1450 = vmatpush3.bf16.msra.mxu0 %v1865_v61 }
  0x44   :  { %1451 = vmatprep.subr.bf16.mxu0 %v1650_v43  ;;  %1432 = vmatpush3.bf16.msra.mxu1 %v1892_v0 }
  0x45   :  { %1437 = vmatprep.subr.bf16.mxu1 %v1650_v43 }
  0x47   :  { %1452 = vmatpush3.bf16.msra.mxu0 %v1874_v62 }
  0x48   :  { %1453 = vmatprep.subr.bf16.mxu0 %v1650_v43 }
  0x4b   :  { %1454 = vmatpush3.bf16.msra.mxu0 %v1883_v63 }
  0x4c   :  { %1455 = vmatprep.subr.bf16.mxu0 %v1650_v43 }
  0x4f   :  { %1456 = vmatpush3.bf16.msra.mxu0 %v1892_v0 }
  0x50   :  { %1473 = vmatprep.subr.bf16.mxu0 %v1650_v43 }
  0xe2   :  { %v1312_v1 = vpop.f32.mrf.mxu0 }
  0xe4   :  { %v1313_v2 = vpop.f32.mrf.mxu0  ;;  %v1334_v3 = vpop.f32.mrf.mxu1 }
  0xe5   :  { %v1314_v13 = vadd.f32 %v1313_v2, %v1312_v1 }
  0xe6   :  { %v1315_v4 = vpop.f32.mrf.mxu0  ;;  %v1335_v5 = vpop.f32.mrf.mxu1 }
  0xe7   :  { %v522_v15 = vadd.f32 %v1314_v13, %v1217_v14  ;;  %v1336_v16 = vadd.f32 %v1335_v5, %v1334_v3 }
  0xe8   :  { %v1316_v6 = vpop.f32.mrf.mxu0  ;;  %v1337_v7 = vpop.f32.mrf.mxu1 }
  0xe9   :  { %v562_v19 = vadd.f32 %v1336_v16, %v522_v15 }
  0xea   :  { %v1338_v8 = vpop.f32.mrf.mxu1 }
  0xec   :  { %v641_v9 = vpop.f32.mrf.mxu1 }
  0xee   :  { %v1423_v10 = vpop.f32.mrf.mxu1 }
  0xf0   :  { %v644_v11 = vpop.f32.mrf.mxu1 }
  0xf2   :  { %v1424_v12 = vpop.f32.mrf.mxu1 }
 0x102   :  { %v1356_v17 = vpop.f32.mrf.mxu0 }
 0x104   :  { %v1357_v18 = vpop.f32.mrf.mxu0 }
 0x105   :  { %v1358_v20 = vadd.f32 %v1357_v18, %v1356_v17 }
 0x106   :  { %v1359_v21 = vpop.f32.mrf.mxu0 }
 0x107   :  { %v602_v22 = vadd.f32 %v1358_v20, %v562_v19 }
 0x108   :  { %v1360_v23 = vpop.f32.mrf.mxu0 }
 0x109   :  { %v642_v24 = vadd.f32 %v641_v9, %v602_v22 }
 0x10b   :  { %v647_v25 = vmax.f32 %v642_v24, 0.0 }
 0x10d   :  { %v648_v26 = vpack.c.bf16 %v647_v25, %v647_v25 }
 0x10f   :  { %1434 = vmatmul.mubr.msk.bf16.vlgmr.msra.gmra.mxu1 %vm670_vm3, %v648_v26 }
 0x110   :  { %1438 = vmatpush3.bf16.msra.mxu1 %v1865_v61  ;;  %1445 = vmatprep.mubr.msk.bf16.mxu1 %vm1651_vm0, %v1650_v43 }
 0x111   :  { %1439 = vmatprep.subr.bf16.mxu1 %v1650_v43 }
 0x114   :  { %1440 = vmatpush3.bf16.msra.mxu1 %v1874_v62 }
 0x115   :  { %1441 = vmatprep.subr.bf16.mxu1 %v1650_v43 }
 0x118   :  { %1442 = vmatpush3.bf16.msra.mxu1 %v1883_v63 }
 0x119   :  { %1443 = vmatprep.subr.bf16.mxu1 %v1650_v43 }
 0x11c   :  { %1444 = vmatpush3.bf16.msra.mxu1 %v1892_v0 }
 0x11d   :  { %1461 = vmatprep.subr.bf16.mxu1 %v1650_v43 }
 0x1cf   :  { %v712_v28 = vpop.f32.mrf.mxu1 }
 0x1d0   :  { %v713_v29 = vadd.f32 %v1915_v27, %v712_v28 }
 0x1d1   :  { %v1435_v30 = vpop.f32.mrf.mxu1 }
 0x1d2   :  { %v718_v31 = vmax.f32 %v713_v29, 0.0 }
 0x1d3   :  { %v715_v32 = vpop.f32.mrf.mxu1 }
 0x1d4   :  { %v719_v33 = vpack.c.bf16 %v718_v31, %v718_v31  ;;  %v1622_v32 = vld [vmem:[%s2035_s5 + $0x8] sm:$0xff]  }
 0x1d5   :  { %v1436_v34 = vpop.f32.mrf.mxu1 }
 0x1d6   :  { %1446 = vmatmul.mubr.msk.bf16.vlgmr.msra.gmra.mxu1 %vm670_vm3, %v719_v33  ;;  %v1623_v33 = vld [vmem:[%s2035_s5] sm:$0xff]  }
 0x1d7   :  { %1462 = vmatpush3.bf16.msra.mxu1 %v1865_v61  ;;  %1469 = vmatprep.mubr.msk.bf16.mxu1 %vm1651_vm0, %v1650_v43 }
 0x1d8   :  { %1463 = vmatprep.subr.bf16.mxu1 %v1650_v43 }
 0x1db   :  { %1464 = vmatpush3.bf16.msra.mxu1 %v1874_v62 }
 0x1dc   :  { %1465 = vmatprep.subr.bf16.mxu1 %v1650_v43 }
 0x1df   :  { %1466 = vmatpush3.bf16.msra.mxu1 %v1883_v63 }
 0x1e0   :  { %1467 = vmatprep.subr.bf16.mxu1 %v1650_v43 }
 0x1e3   :  { %1468 = vmatpush3.bf16.msra.mxu1 %v1892_v0 }
 0x1e4   :  { %1485 = vmatprep.subr.bf16.mxu1 %v1650_v43 }
 0x296   :  { %v757_v35 = vpop.f32.mrf.mxu1 }
 0x297   :  { %v758_v36 = vadd.f32 %v1915_v27, %v757_v35 }
 0x298   :  { %v1447_v37 = vpop.f32.mrf.mxu1 }
 0x299   :  { %v763_v38 = vmax.f32 %v758_v36, 0.0 }
 0x29a   :  { %v760_v39 = vpop.f32.mrf.mxu1 }
 0x29b   :  { %v764_v40 = vpack.c.bf16 %v763_v38, %v763_v38 }
 0x29c   :  { %v1448_v41 = vpop.f32.mrf.mxu1 }
 0x29d   :  { %1458 = vmatmul.mubr.msk.bf16.vlgmr.msra.gmra.mxu0 %vm670_vm3, %v764_v40  ;;  %v1219_v41 = vld [vmem:[%s2036_s6] ss:$0 sm:$0xff] }
 0x29e   :  { %1474 = vmatpush3.bf16.msra.mxu0 %v1865_v61  ;;  %1481 = vmatprep.mubr.msk.bf16.mxu0 %vm1651_vm0, %v1650_v43 }
 0x29f   :  { %1475 = vmatprep.subr.bf16.mxu0 %v1650_v43 }
 0x2a2   :  { %1476 = vmatpush3.bf16.msra.mxu0 %v1874_v62 }
 0x2a3   :  { %1477 = vmatprep.subr.bf16.mxu0 %v1650_v43 }
 0x2a6   :  { %1478 = vmatpush3.bf16.msra.mxu0 %v1883_v63 }
 0x2a7   :  { %1479 = vmatprep.subr.bf16.mxu0 %v1650_v43 }
 0x2aa   :  { %1480 = vmatpush3.bf16.msra.mxu0 %v1892_v0 }
 0x2ab   :  { %1497 = vmatprep.subr.bf16.mxu0 %v1650_v43 }
 0x35d   :  { %v802_v42 = vpop.f32.mrf.mxu0 }
 0x35e   :  { %v803_v44 = vadd.f32 %v1915_v27, %v802_v42 }
 0x35f   :  { %v1459_v45 = vpop.f32.mrf.mxu0 }
 0x360   :  { %v808_v46 = vmax.f32 %v803_v44, 0.0 }
 0x361   :  { %v805_v47 = vpop.f32.mrf.mxu0 }
 0x362   :  { %v809_v48 = vpack.c.bf16 %v808_v46, %v808_v46 }
 0x363   :  { %v1460_v49 = vpop.f32.mrf.mxu0 }
 0x364   :  { %1470 = vmatmul.mubr.msk.bf16.vlgmr.msra.gmra.mxu1 %vm670_vm3, %v809_v48 }
 0x365   :  { %1486 = vmatpush3.bf16.msra.mxu1 %v1865_v61  ;;  %1493 = vmatprep.mubr.msk.bf16.mxu1 %vm1651_vm0, %v1650_v43 }
 0x366   :  { %1487 = vmatprep.subr.bf16.mxu1 %v1650_v43 }
 0x369   :  { %1488 = vmatpush3.bf16.msra.mxu1 %v1874_v62 }
 0x36a   :  { %1489 = vmatprep.subr.bf16.mxu1 %v1650_v43 }
 0x36d   :  { %1490 = vmatpush3.bf16.msra.mxu1 %v1883_v63 }
 0x36e   :  { %1491 = vmatprep.subr.bf16.mxu1 %v1650_v43 }
 0x371   :  { %1492 = vmatpush3.bf16.msra.mxu1 %v1892_v0 }
 0x372   :  { %1509 = vmatprep.subr.bf16.mxu1 %v1650_v43 }
 0x424   :  { %v847_v50 = vpop.f32.mrf.mxu1 }
 0x425   :  { %v848_v51 = vadd.f32 %v1915_v27, %v847_v50 }
 0x426   :  { %v1471_v52 = vpop.f32.mrf.mxu1 }
 0x427   :  { %v853_v53 = vmax.f32 %v848_v51, 0.0 }
 0x428   :  { %v850_v54 = vpop.f32.mrf.mxu1 }
 0x429   :  { %v854_v55 = vpack.c.bf16 %v853_v53, %v853_v53 }
 0x42a   :  { %v1472_v56 = vpop.f32.mrf.mxu1 }
 0x42b   :  { %1482 = vmatmul.mubr.msk.bf16.vlgmr.msra.gmra.mxu0 %vm670_vm3, %v854_v55 }
 0x42c   :  { %1498 = vmatpush3.bf16.msra.mxu0 %v1865_v61  ;;  %1505 = vmatprep.mubr.msk.bf16.mxu0 %vm1651_vm0, %v1650_v43 }
 0x42d   :  { %1499 = vmatprep.subr.bf16.mxu0 %v1650_v43 }
 0x430   :  { %1500 = vmatpush3.bf16.msra.mxu0 %v1874_v62 }
 0x431   :  { %1501 = vmatprep.subr.bf16.mxu0 %v1650_v43 }
 0x434   :  { %1502 = vmatpush3.bf16.msra.mxu0 %v1883_v63 }
 0x435   :  { %1503 = vmatprep.subr.bf16.mxu0 %v1650_v43 }
 0x438   :  { %1504 = vmatpush3.bf16.msra.mxu0 %v1892_v0 }
 0x439   :  { %1521 = vmatprep.subr.bf16.mxu0 %v1650_v43 }
 0x4eb   :  { %v892_v57 = vpop.f32.mrf.mxu0 }
 0x4ec   :  { %v893_v58 = vadd.f32 %v1915_v27, %v892_v57 }
 0x4ed   :  { %v1483_v59 = vpop.f32.mrf.mxu0 }
 0x4ee   :  { %v898_v60 = vmax.f32 %v893_v58, 0.0 }
 0x4ef   :  { %v895_v1 = vpop.f32.mrf.mxu0 }
 0x4f0   :  { %v899_v2 = vpack.c.bf16 %v898_v60, %v898_v60 }
 0x4f1   :  { %v1484_v3 = vpop.f32.mrf.mxu0 }
 0x4f2   :  { %1494 = vmatmul.mubr.msk.bf16.vlgmr.msra.gmra.mxu1 %vm670_vm3, %v899_v2 }
 0x4f3   :  { %1510 = vmatpush3.bf16.msra.mxu1 %v1865_v61  ;;  %1517 = vmatprep.mubr.msk.bf16.mxu1 %vm1651_vm0, %v1650_v43 }
 0x4f4   :  { %1511 = vmatprep.subr.bf16.mxu1 %v1650_v43 }
 0x4f7   :  { %1512 = vmatpush3.bf16.msra.mxu1 %v1874_v62 }
 0x4f8   :  { %1513 = vmatprep.subr.bf16.mxu1 %v1650_v43 }
 0x4fb   :  { %1514 = vmatpush3.bf16.msra.mxu1 %v1883_v63 }
 0x4fc   :  { %1515 = vmatprep.subr.bf16.mxu1 %v1650_v43 }
 0x4ff   :  { %1516 = vmatpush3.bf16.msra.mxu1 %v1892_v0 }
 0x500   :  { %1533 = vmatprep.subr.bf16.mxu1 %v1650_v43 }
 0x5b2   :  { %v937_v4 = vpop.f32.mrf.mxu1 }
 0x5b3   :  { %v938_v5 = vadd.f32 %v1915_v27, %v937_v4 }
 0x5b4   :  { %v1495_v6 = vpop.f32.mrf.mxu1 }
 0x5b5   :  { %v943_v7 = vmax.f32 %v938_v5, 0.0 }
 0x5b6   :  { %v940_v8 = vpop.f32.mrf.mxu1 }
 0x5b7   :  { %v944_v9 = vpack.c.bf16 %v943_v7, %v943_v7 }
 0x5b8   :  { %v1496_v10 = vpop.f32.mrf.mxu1 }
 0x5b9   :  { %1506 = vmatmul.mubr.msk.bf16.vlgmr.msra.gmra.mxu0 %vm670_vm3, %v944_v9 }
 0x5ba   :  { %1522 = vmatpush3.bf16.msra.mxu0 %v1865_v61  ;;  %1529 = vmatprep.mubr.msk.bf16.mxu0 %vm1651_vm0, %v1650_v43 }
 0x5bb   :  { %1523 = vmatprep.subr.bf16.mxu0 %v1650_v43 }
 0x5be   :  { %1524 = vmatpush3.bf16.msra.mxu0 %v1874_v62 }
 0x5bf   :  { %1525 = vmatprep.subr.bf16.mxu0 %v1650_v43 }
 0x5c2   :  { %1526 = vmatpush3.bf16.msra.mxu0 %v1883_v63 }
 0x5c3   :  { %1527 = vmatprep.subr.bf16.mxu0 %v1650_v43 }
 0x5c6   :  { %1528 = vmatpush3.bf16.msra.mxu0 %v1892_v0 }
 0x5c7   :  { %1545 = vmatprep.subr.bf16.mxu0 %v1650_v43 }
 0x679   :  { %v982_v11 = vpop.f32.mrf.mxu0 }
 0x67a   :  { %v983_v12 = vadd.f32 %v1915_v27, %v982_v11 }
 0x67b   :  { %v1507_v13 = vpop.f32.mrf.mxu0 }
 0x67c   :  { %v988_v14 = vmax.f32 %v983_v12, 0.0 }
 0x67d   :  { %v985_v15 = vpop.f32.mrf.mxu0 }
 0x67e   :  { %v989_v16 = vpack.c.bf16 %v988_v14, %v988_v14 }
 0x67f   :  { %v1508_v17 = vpop.f32.mrf.mxu0 }
 0x680   :  { %1518 = vmatmul.mubr.msk.bf16.vlgmr.msra.gmra.mxu1 %vm670_vm3, %v989_v16 }
 0x681   :  { %1534 = vmatpush3.bf16.msra.mxu1 %v1865_v61  ;;  %1541 = vmatprep.mubr.msk.bf16.mxu1 %vm1651_vm0, %v1650_v43 }
 0x682   :  { %1535 = vmatprep.subr.bf16.mxu1 %v1650_v43 }
 0x685   :  { %1536 = vmatpush3.bf16.msra.mxu1 %v1874_v62  ;;  %v1620_v62 = vld [vmem:[%s2035_s5 + $0x18] ss:$0 sps:$4 sm:$0x11]  }
 0x686   :  { %1537 = vmatprep.subr.bf16.mxu1 %v1650_v43 }
 0x689   :  { %1538 = vmatpush3.bf16.msra.mxu1 %v1883_v63  ;;  %v1150_v63 = vsel %vm674_vm2, %v1620_v62, 0 }
 0x68a   :  { %1539 = vmatprep.subr.bf16.mxu1 %v1650_v43 }
 0x68d   :  { %1540 = vmatpush3.bf16.msra.mxu1 %v1892_v0  ;;  %v1621_v0 = vld [vmem:[%s2035_s5 + $0x10] sm:$0xff]   ;;  %s1652_s5 = smov [#allocation2]  }
 0x68e   :  { %s1209_s9 = sshll.u32 %s1652_s5, 4  ;;  %s1210_s9 = int_to_ptr.vmem [resolvable:$true] %s1209_s9 }
 0x68f   :  { %s1628_s6 = scalar_lea.vmem %s1210_s9, 128  ;;  %p1633_p1 = scmp.lt.s32.totalorder %s1210_s9, %s1210_s9 }
 0x690   :  { %p1629_p0 = scmp.ne.s32.totalorder %s1210_s9, %s1628_s6  ;;  %p1634_p2 = scmp.lt.s32.totalorder %s1628_s6, %s1628_s6 }
 0x692   :  { %p1635_p3 = por %p1634_p2, %p1633_p1 }
 0x694   :  { %p1636_p4 = pnand %p1635_p3, %p1629_p0 }
 0x740   :  { %v1027_v18 = vpop.f32.mrf.mxu1 }
 0x741   :  { %v1028_v19 = vadd.f32 %v1915_v27, %v1027_v18 }
 0x742   :  { %v1519_v20 = vpop.f32.mrf.mxu1 }
 0x743   :  { %v1033_v61 = vmax.f32 %v1028_v19, 0.0 }
 0x744   :  { %v1030_v21 = vpop.f32.mrf.mxu1 }
 0x745   :  { %v1034_v22 = vpack.c.bf16 %v1033_v61, %v1033_v61 }
 0x746   :  { %v1520_v23 = vpop.f32.mrf.mxu1 }
 0x747   :  { %1530 = vmatmul.mubr.msk.bf16.vlgmr.msra.gmra.mxu0 %vm670_vm3, %v1034_v22 }
 0x748   :  { %1553 = vmatprep.mubr.msk.bf16.mxu0 %vm1651_vm0, %v1650_v43  ;;  %1546 = vmatpush3.bf16.msra.mxu0 %v1150_v63 }
 0x749   :  { %1547 = vmatprep.subr.bf16.mxu0 %v1650_v43 }
 0x74c   :  { %1548 = vmatpush3.bf16.msra.mxu0 %v1621_v0 }
 0x74d   :  { %1549 = vmatprep.subr.bf16.mxu0 %v1650_v43 }
 0x750   :  { %1550 = vmatpush3.bf16.msra.mxu0 %v1622_v32 }
 0x751   :  { %1551 = vmatprep.subr.bf16.mxu0 %v1650_v43 }
 0x754   :  { %1552 = vmatpush3.bf16.msra.mxu0 %v1623_v33 }
 0x807   :  { %v1072_v24 = vpop.f32.mrf.mxu0 }
 0x808   :  { %v1073_v25 = vadd.f32 %v1915_v27, %v1072_v24 }
 0x809   :  { %v1531_v26 = vpop.f32.mrf.mxu0 }
 0x80a   :  { %v1078_v28 = vmax.f32 %v1073_v25, 0.0 }
 0x80b   :  { %v1075_v29 = vpop.f32.mrf.mxu0 }
 0x80c   :  { %v1079_v30 = vpack.c.bf16 %v1078_v28, %v1078_v28 }
 0x80d   :  { %v1532_v31 = vpop.f32.mrf.mxu0 }
 0x80e   :  { %1542 = vmatmul.mubr.msk.bf16.vlgmr.msra.gmra.mxu1 %vm670_vm3, %v1079_v30 }
 0x8ce   :  { %v1117_v34 = vpop.f32.mrf.mxu1 }
 0x8cf   :  { %v1118_v35 = vadd.f32 %v1915_v27, %v1117_v34 }
 0x8d0   :  { %v1543_v36 = vpop.f32.mrf.mxu1 }
 0x8d1   :  { %v1123_v37 = vmax.f32 %v1118_v35, 0.0 }
 0x8d2   :  { %v1120_v38 = vpop.f32.mrf.mxu1 }
 0x8d3   :  { %v1124_v39 = vpack.c.bf16 %v1123_v37, %v1123_v37 }
 0x8d4   :  { %v1544_v40 = vpop.f32.mrf.mxu1 }
 0x8d5   :  { %1554 = vmatmul.mubr.msk.bf16.vlgmr.msra.gmra.mxu0 %vm670_vm3, %v1124_v39 }
 0x995   :  { %v1186_v43 = vpop.f32.mrf.mxu0 }
 0x996   :  { %v1187_v42 = vadd.f32 %v1219_v41, %v1186_v43 }
 0x997   :  { %v1555_v44 = vpop.f32.mrf.mxu0 }
 0x998   :  { %1192 = vmax.xlane.f32.xlu0 %v1187_v42 }
 0x999   :  { %v1189_v45 = vpop.f32.mrf.mxu0 }
 0x99b   :  { %v1556_v46 = vpop.f32.mrf.mxu0 }
 0xa21   :  { %v1193_v47 = vpop.xlane.xlu0 %1192 }
 0xa22   :  { %v1194_v48 = vsub.f32 %v1187_v42, %v1193_v47 }
 0xa24   :  { %v1195_v27 = vmul.f32 1.442695, %v1194_v48 }
 0xa26   :  { %1624 = vpow2.f32 %v1195_v27 }
 0xa33   :  { %v1625_v49 = vpop.eup %1624 }
 0xa34   :  { %1197 = vadd.xlane.f32.xlu0 %v1625_v49 }
 0xabd   :  { %v1198_v50 = vpop.xlane.xlu0 %1197 }
 0xabe   :  { %1626 = vlog2.f32 %v1198_v50 }
 0xacb   :  { %v1627_v51 = vpop.eup %1626 }
 0xacc   :  { %v1200_v52 = vmul.f32 0.6931472, %v1627_v51 }
 0xace   :  { %v1201_v53 = vsub.f32 %v1194_v48, %v1200_v52 }
 0xad0   :  { %1202 = vst [vmem:[#allocation2] sm:$0xff] %v1201_v53 }
 0xad1   :  { %1639 = shalt.err (!%p1636_p4)
}
 0xad2   :  { %1212 = dma.vmem_to_hbm [thread:$0]  %s1210_s9, 128, %s2037_s7, [#allocation3]  }
 0xad3   :  { %1648 = dma.done.wait [#allocation3], 128  }
 0xad4   :  { %1649 = vsyncadd [#allocation3], 4294967168 }
 0xad5   :  { %1216 = vsyncpa [#allocation3], 1 }

</bundles_post_ra>
